<compile_context>
chip_gen: v7x
topology: tpu7x:2x2x1
jax: 0.10.0
libtpu: 0.0.40
codegen_flags: <defaults>
</compile_context>

<pallas_src>
import jax
import jax.numpy as jnp
from jax.experimental import pallas as pl
from jax.experimental.pallas import tpu as pltpu


def _round_up(x, m):
    return ((x + m - 1) // m) * m


def _make_kernel(total_rows: int):
    """total_rows = true (unpadded) batch size used for the mean."""

    inv_rows = 1.0 / float(total_rows)

    def kernel(a_ref, b_ref, t_ref, o_ref, acc_ref):
        i = pl.program_id(0)

        @pl.when(i == 0)
        def _init():
            acc_ref[...] = jnp.zeros_like(acc_ref)

        # Upcast in-kernel (VPU) -- inputs stay in native dtype in HBM.
        a = a_ref[...].astype(jnp.float32)               # (TB, D)
        b = b_ref[...].astype(jnp.float32)               # (TB, D)
        dot = jnp.sum(a * b, axis=1, keepdims=True)      # (TB, 1) lane reduce
        diff = dot - t_ref[...]                          # target precomputed in wrapper
        acc_ref[...] += diff * diff                      # per-row partial sums (VPU only)

        @pl.when(i == pl.num_programs(0) - 1)
        def _finalize():
            # One sublane reduction + mean at the very end.
            o_ref[...] = jnp.sum(acc_ref[...], keepdims=True) * inv_rows

    return kernel


def _pick_block_rows(B, D, itemsize, gran):
    """Byte-budget-driven tile rows, VMEM-padding aware."""
    try:
        phys_vmem = int(pltpu.get_tpu_info().vmem_capacity_bytes)
    except Exception:
        phys_vmem = 64 * 1024 * 1024  # conservative (v7x per-TC VMEM)

    # Total streamed footprint cap: <= 48 MiB and <= 75% of physical VMEM.
    total_cap = min(int(phys_vmem * 0.75), 48 * 1024 * 1024)

    # Bytes per tile row actually resident in VMEM:
    #   2 embedding inputs x 2 pipeline buffers x lane-padded row
    # + 2 pipeline buffers of the (TB,1) target, lane-padded to 128 lanes
    # + 1 (TB,1) f32 scratch accumulator, lane-padded to 128 lanes
    d_pad = _round_up(D, 128)
    bytes_per_row = 4 * d_pad * itemsize + 2 * 128 * 4 + 128 * 4

    tb = total_cap // bytes_per_row
    tb = min(int(tb), 8192)                      # amortizes the ~0.35us/step overhead
    tb = max(gran, (tb // gran) * gran)
    tb = min(tb, _round_up(B, gran))             # never larger than the padded batch
    return tb, phys_vmem, bytes_per_row


def dot_product_loss(embedding_a, embedding_b, num_transformations, *, block_rows=None):
    """embedding_a/embedding_b: (B, D) any float dtype; num_transformations: (B,).
    Returns the scalar f32 MSE loss."""
    B, D = embedding_a.shape
    itemsize = jnp.dtype(embedding_a.dtype).itemsize
    # Sublane-packing granularity: f32 -> 8 rows, bf16 -> 16, int8/fp8 -> 32.
    gran = max(8, 32 // max(1, itemsize))

    # Hoist the divide out of the per-step vector path (tiny (B,) op).
    target = (1.0 / num_transformations.astype(jnp.float32)).reshape(B, 1)

    tb_auto, phys_vmem, bytes_per_row = _pick_block_rows(B, D, itemsize, gran)
    TB = int(block_rows) if block_rows is not None else tb_auto
    assert TB > 0 and TB % gran == 0, (
        f"block_rows must be a positive multiple of {gran} for dtype "
        f"{embedding_a.dtype}")

    B_pad = _round_up(B, TB)
    if B_pad != B:
        pad = B_pad - B
        # Padded rows: zero embeddings AND zero target -> diff == 0 exactly,
        # so no in-kernel mask is needed.
        embedding_a = jnp.pad(embedding_a, ((0, pad), (0, 0)))
        embedding_b = jnp.pad(embedding_b, ((0, pad), (0, 0)))
        target = jnp.pad(target, ((0, pad), (0, 0)))
    num_tiles = B_pad // TB

    # Explicit scoped-VMEM limit so large tiles compile on v5e (16 MiB default)
    # and stay within headroom on v7x (64 MiB physical).
    footprint = TB * bytes_per_row + (1 << 20)
    vmem_limit = max(footprint + (8 << 20), 32 << 20)
    vmem_limit = min(vmem_limit, phys_vmem - (4 << 20))
    vmem_limit = max(vmem_limit, 16 << 20)

    cost = pl.CostEstimate(
        flops=2 * B_pad * D + 3 * B_pad,
        transcendentals=0,
        bytes_accessed=2 * B_pad * D * itemsize + B_pad * 4 + 4,
    )

    out = pl.pallas_call(
        _make_kernel(B),
        out_shape=jax.ShapeDtypeStruct((1, 1), jnp.float32),
        grid=(num_tiles,),
        in_specs=[
            pl.BlockSpec((TB, D), lambda i: (i, 0)),
            pl.BlockSpec((TB, D), lambda i: (i, 0)),
            pl.BlockSpec((TB, 1), lambda i: (i, 0)),
        ],
        out_specs=pl.BlockSpec((1, 1), lambda i: (0, 0)),
        scratch_shapes=[pltpu.VMEM((TB, 1), jnp.float32)],
        compiler_params=pltpu.CompilerParams(
            dimension_semantics=("arbitrary",),
            vmem_limit_bytes=int(vmem_limit),
        ),
        cost_estimate=cost,
    )(embedding_a, embedding_b, target)
    return out[0, 0]


if __name__ == "__main__":
    key = jax.random.PRNGKey(0)
    k1, k2, k3 = jax.random.split(key, 3)

    # B deliberately not a multiple of the sublane granularity to exercise the
    # zero-padding path (padded rows contribute exactly zero by construction).
    B, D = 20, 128
    embedding_a = jax.random.normal(k1, (B, D), dtype=jnp.float32)
    embedding_b = jax.random.normal(k2, (B, D), dtype=jnp.float32)
    # number of transformations per sample, in {1,...,4}
    num_transformations = jax.random.randint(k3, (B,), 1, 5).astype(jnp.float32)

    # pure-JAX reference
    dot_ref = jnp.sum(embedding_a * embedding_b, axis=1)
    target_ref = 1.0 / num_transformations
    loss_ref = jnp.mean((dot_ref - target_ref) ** 2)

    # 1) auto (VMEM-budget) tile size -> single padded tile here
    loss = jax.block_until_ready(
        dot_product_loss(embedding_a, embedding_b, num_transformations))
    assert jnp.allclose(loss, loss_ref, rtol=1e-5, atol=1e-5), (loss, loss_ref)

    # 2) forced small tile -> multi-step streamed accumulation (3 grid steps)
    loss_tiled = jax.block_until_ready(
        dot_product_loss(embedding_a, embedding_b, num_transformations, block_rows=8))
    assert jnp.allclose(loss_tiled, loss_ref, rtol=1e-5, atol=1e-5), (loss_tiled, loss_ref)

    print("KERNEL_OK")
</pallas_src>

<mosaic_0001>
module attributes {stable_mosaic.version = 11 : i64} {
  func.func @kernel(%arg0: i32, %arg1: memref<24x128xf32, #tpu.memory_space<vmem>>, %arg2: memref<24x128xf32, #tpu.memory_space<vmem>>, %arg3: memref<24x1xf32, #tpu.memory_space<vmem>>, %arg4: memref<1x1xf32, #tpu.memory_space<vmem>>, %arg5: memref<24x1xf32, #tpu.memory_space<vmem>>) attributes {dimension_semantics = [#tpu.dimension_semantics<arbitrary>], iteration_bounds = array<i64: 1>, scalar_prefetch = 0 : i64, scratch_operands = 1 : i64, tpu.core_type = #tpu.core_type<tc>, window_params = [{transform_indices = @transform_0, window_bounds = array<i64: 24, 128>}, {transform_indices = @transform_1, window_bounds = array<i64: 24, 128>}, {transform_indices = @transform_2, window_bounds = array<i64: 24, 1>}, {pipeline_mode = #tpu.pipeline_mode<synchronous>, transform_indices = @transform_3, window_bounds = array<i64: 1, 1>}]} {
    %c0_i32 = arith.constant 0 : i32
    %0 = arith.cmpi eq, %arg0, %c0_i32 : i32
    %1 = arith.extui %0 : i1 to i32
    %c0_i32_0 = arith.constant 0 : i32
    %2 = arith.cmpi ne, %1, %c0_i32_0 : i32
    scf.if %2 {
      %cst_12 = arith.constant 0.000000e+00 : f32
      %17 = vector.broadcast %cst_12 : f32 to vector<24x1xf32>
      %c0_13 = arith.constant 0 : index
      %c0_14 = arith.constant 0 : index
      %18 = vector.load %arg5[%c0_13, %c0_14] : memref<24x1xf32, #tpu.memory_space<vmem>>, vector<24x1xf32>
      tpu.vector_store %arg5[%c0_13, %c0_14], %17 {strides = array<i32>} : memref<24x1xf32, #tpu.memory_space<vmem>>, vector<24x1xf32>,
    } else {
    }
    %c0 = arith.constant 0 : index
    %c0_1 = arith.constant 0 : index
    %3 = vector.load %arg1[%c0, %c0_1] : memref<24x128xf32, #tpu.memory_space<vmem>>, vector<24x128xf32>
    %c0_2 = arith.constant 0 : index
    %c0_3 = arith.constant 0 : index
    %4 = vector.load %arg2[%c0_2, %c0_3] : memref<24x128xf32, #tpu.memory_space<vmem>>, vector<24x128xf32>
    %5 = arith.mulf %3, %4 : vector<24x128xf32>
    %cst = arith.constant dense<0.000000e+00> : vector<24xf32>
    %6 = vector.multi_reduction <add>, %5, %cst [1] : vector<24x128xf32> to vector<24xf32>
    %7 = vector.shape_cast %6 : vector<24xf32> to vector<24x1xf32>
    %c0_4 = arith.constant 0 : index
    %c0_5 = arith.constant 0 : index
    %8 = vector.load %arg3[%c0_4, %c0_5] : memref<24x1xf32, #tpu.memory_space<vmem>>, vector<24x1xf32>
    %9 = arith.subf %7, %8 : vector<24x1xf32>
    %c0_6 = arith.constant 0 : index
    %c0_7 = arith.constant 0 : index
    %10 = vector.load %arg5[%c0_6, %c0_7] : memref<24x1xf32, #tpu.memory_space<vmem>>, vector<24x1xf32>
    %11 = arith.mulf %9, %9 : vector<24x1xf32>
    %12 = arith.addf %10, %11 : vector<24x1xf32>
    %c0_8 = arith.constant 0 : index
    %c0_9 = arith.constant 0 : index
    %13 = vector.load %arg5[%c0_8, %c0_9] : memref<24x1xf32, #tpu.memory_space<vmem>>, vector<24x1xf32>
    tpu.vector_store %arg5[%c0_8, %c0_9], %12 {strides = array<i32>} : memref<24x1xf32, #tpu.memory_space<vmem>>, vector<24x1xf32>,
    %c0_i32_10 = arith.constant 0 : i32
    %14 = arith.cmpi eq, %arg0, %c0_i32_10 : i32
    %15 = arith.extui %14 : i1 to i32
    %c0_i32_11 = arith.constant 0 : i32
    %16 = arith.cmpi ne, %15, %c0_i32_11 : i32
    scf.if %16 {
      %c0_12 = arith.constant 0 : index
      %c0_13 = arith.constant 0 : index
      %17 = vector.load %arg5[%c0_12, %c0_13] : memref<24x1xf32, #tpu.memory_space<vmem>>, vector<24x1xf32>
      %18 = vector.shape_cast %17 : vector<24x1xf32> to vector<1x24x1xf32>
      %cst_14 = arith.constant dense<0.000000e+00> : vector<1xf32>
      %19 = vector.multi_reduction <add>, %18, %cst_14 [1, 2] : vector<1x24x1xf32> to vector<1xf32>
      %20 = vector.shape_cast %19 : vector<1xf32> to vector<1x1x1xf32>
      %21 = vector.extract %20[0, 0, 0] : f32 from vector<1x1x1xf32>
      %22 = vector.broadcast %21 : f32 to vector<1x1xf32>
      %cst_15 = arith.constant 5.000000e-02 : f32
      %23 = vector.broadcast %cst_15 : f32 to vector<1x1xf32>
      %24 = arith.mulf %22, %23 : vector<1x1xf32>
      %c0_16 = arith.constant 0 : index
      %c0_17 = arith.constant 0 : index
      %25 = vector.load %arg4[%c0_16, %c0_17] : memref<1x1xf32, #tpu.memory_space<vmem>>, vector<1x1xf32>
      tpu.vector_store %arg4[%c0_16, %c0_17], %24 {strides = array<i32>} : memref<1x1xf32, #tpu.memory_space<vmem>>, vector<1x1xf32>,
    } else {
    }
    return
  }
  func.func @transform_0(%arg0: i32) -> (i32, i32) {
    %c0_i32 = arith.constant 0 : i32
    %c0_i32_0 = arith.constant 0 : i32
    return %arg0, %c0_i32 : i32, i32
  }
  func.func @transform_1(%arg0: i32) -> (i32, i32) {
    %c0_i32 = arith.constant 0 : i32
    %c0_i32_0 = arith.constant 0 : i32
    return %arg0, %c0_i32 : i32, i32
  }
  func.func @transform_2(%arg0: i32) -> (i32, i32) {
    %c0_i32 = arith.constant 0 : i32
    %c0_i32_0 = arith.constant 0 : i32
    return %arg0, %c0_i32 : i32, i32
  }
  func.func @transform_3(%arg0: i32) -> (i32, i32) {
    %c0_i32 = arith.constant 0 : i32
    %c0_i32_0 = arith.constant 0 : i32
    %c0_i32_1 = arith.constant 0 : i32
    return %c0_i32, %c0_i32_0 : i32, i32
  }
}

</mosaic_0001>

<bundles_post_ra>
// kernel: tpu_custom_call.1
= control target key start
LH: loop header
LB: loop body
LE: loop exit
PB: predicated region body
PF: predicated region fallthrough
CT: control target
= control target key end

     0   :  { %8 = vsyncpa [#allocation4], 0  ;;  %s241_s0 = inlined_call_operand.vmem [shape: f32[24,128], index: 0, kind: input, shape index: {}]   ;;  %s242_s1 = inlined_call_operand.hbm [shape: f32[24,128], index: 1, kind: input, shape index: {}]   ;;  %s243_s2 = inlined_call_operand.vmem [shape: f32[24,1], index: 2, kind: input, shape index: {}]   ;;  %s244_s3 = inlined_call_operand.hbm [shape: f32[1,1], index: 3, kind: output, shape index: {}]  }
   0x1   :  { %9 = vsyncpa [#allocation5], 0  ;;  %s165_s12 = smov [#allocation3]   ;;  %s117_s16 = scalar_lea.hbm %s242_s1, 384 }
   0x2   :  { %s17_s13 = sshll.u32 %s165_s12, 4  ;;  %p118_p0 = scmp.ne.s32.totalorder %s242_s1, %s117_s16  ;;  %s18_s13 = int_to_ptr.vmem [resolvable:$true] %s17_s13 }
   0x3   :  { %p121_p1 = scmp.lt.u32.totalorder %s117_s16, %s242_s1 }
   0x5   :  { %p123_p2 = pnand %p121_p1, %p118_p0 }
   0x7   :  { %126 = shalt.err (!%p123_p2)
}
   0x8   :  { %s127_s21 = scalar_lea.vmem %s18_s13, 384  ;;  %p132_p4 = scmp.lt.s32.totalorder %s18_s13, %s18_s13 }
   0x9   :  { %p128_p3 = scmp.ne.s32.totalorder %s18_s13, %s127_s21  ;;  %p133_p5 = scmp.lt.s32.totalorder %s127_s21, %s127_s21 }
   0xb   :  { %p134_p6 = por %p133_p5, %p132_p4 }
   0xd   :  { %p135_p7 = pnand %p134_p6, %p128_p3 }
   0xf   :  { %138 = shalt.err (!%p135_p7)
}
  0x10   :  { %s166_s22 = smov 128   ;;  %s167_s23 = smov 8  }
  0x11   :  { %23 = dma.hbm_to_vmem [thread:$0]  %s242_s1, 384, %s18_s13, [#allocation4], %s166_s22, %s166_s22, %s167_s23  }
  0x12   :  { %161 = dma.done.wait [#allocation4], 384  }
  0x13   :  { %162 = vsyncadd [#allocation4], 4294966912  ;;  %vm33_vm0 = vcmask 7168   ;;  %v168_v0 = vmov 0.0   ;;  %v37_v1 = vld [vmem:[%s241_s0] sm:$0xff]  ;;  %v40_v2 = vld [vmem:[#allocation3] sm:$0xff] }
  0x14   :  { %34 = vst.msk [vmem:[#allocation2] sm:$0xff] %vm33_vm0, %v168_v0  ;;  %35 = vst.msk [vmem:[#allocation2 + $0x8] sm:$0xff] %vm33_vm0, %v168_v0  ;;  %v38_v3 = vld [vmem:[%s241_s0 + $0x8] sm:$0xff]  ;;  %v43_v4 = vmul.f32 %v40_v2, %v37_v1  ;;  %v41_v5 = vld [vmem:[#allocation3 + $0x8] sm:$0xff]  ;;  %vm93_vm1 = vcmask 0  }
  0x15   :  { %36 = vst.msk [vmem:[#allocation2 + $0x10] sm:$0xff] %vm33_vm0, %v168_v0  ;;  %v39_v6 = vld [vmem:[%s241_s0 + $0x10] sm:$0xff]  ;;  %v42_v7 = vld [vmem:[#allocation3 + $0x10] sm:$0xff]  ;;  %v44_v9 = vmul.f32 %v41_v5, %v38_v3  ;;  %v52_v10 = vld [vmem:[%s243_s2] sm:$0xff] }
  0x16   :  { %v45_v8 = vmul.f32 %v42_v7, %v39_v6  ;;  %46 = vadd.xlane.f32.xlu0 %v43_v4  ;;  %v54_v11 = vld [vmem:[%s243_s2 + $0x10] sm:$0xff]  ;;  %v53_v16 = vld [vmem:[%s243_s2 + $0x8] sm:$0xff]  ;;  %s169_s2 = smov [#allocation6]  }
  0x17   :  { %s101_s9 = sshll.u32 %s169_s2, 4  ;;  %s102_s9 = int_to_ptr.vmem [resolvable:$true] %s101_s9 }
  0x18   :  { %50 = vadd.xlane.f32.xlu1 %v45_v8  ;;  %s139_s11 = scalar_lea.vmem %s102_s9, 16  ;;  %s143_s12 = scalar_lea.vmem %s102_s9, 32 }
  0x19   :  { %p140_p8 = scmp.ne.s32.totalorder %s102_s9, %s139_s11  ;;  %p144_p9 = scmp.lt.s32.totalorder %s102_s9, %s102_s9 }
  0x1a   :  { %48 = vadd.xlane.f32.xlu0 %v44_v9  ;;  %p145_p10 = scmp.lt.s32.totalorder %s143_s12, %s139_s11 }
  0x1b   :  { %v58_v15 = vld [vmem:[#allocation2] sm:$0xff]  ;;  %v59_v24 = vld [vmem:[#allocation2 + $0x8] sm:$0xff] }
  0x1c   :  { %v60_v19 = vld [vmem:[#allocation2 + $0x10] sm:$0xff]  ;;  %p146_p11 = por %p145_p10, %p144_p9 }
  0x1e   :  { %p147_p12 = pnand %p146_p11, %p140_p8 }
  0xa3   :  { %v47_v12 = vpop.xlane.xlu0 %46 }
  0xa4   :  { %v55_v13 = vsub.f32 %v47_v12, %v52_v10 }
  0xa5   :  { %v51_v14 = vpop.xlane.xlu1 %50 }
  0xa6   :  { %v57_v17 = vsub.f32 %v51_v14, %v54_v11  ;;  %v61_v18 = vmul.f32 %v55_v13, %v55_v13 }
  0xa7   :  { %v49_v20 = vpop.xlane.xlu0 %48 }
  0xa8   :  { %v63_v21 = vmul.f32 %v57_v17, %v57_v17  ;;  %v64_v22 = vadd.f32 %v61_v18, %v58_v15  ;;  %v56_v23 = vsub.f32 %v49_v20, %v53_v16 }
  0xaa   :  { %v66_v25 = vadd.f32 %v63_v21, %v60_v19  ;;  %68 = vst.msk [vmem:[#allocation2] sm:$0xff] %vm33_vm0, %v64_v22  ;;  %v62_v26 = vmul.f32 %v56_v23, %v56_v23 }
  0xac   :  { %70 = vst.msk [vmem:[#allocation2 + $0x10] sm:$0xff] %vm33_vm0, %v66_v25  ;;  %v65_v27 = vadd.f32 %v62_v26, %v59_v24 }
  0xae   :  { %69 = vst.msk [vmem:[#allocation2 + $0x8] sm:$0xff] %vm33_vm0, %v65_v27 }
  0xb1   :  { %v74_v28 = vld [vmem:[#allocation2] sm:$0xff] }
  0xb2   :  { %v77_v31 = vsel %vm33_vm0, %v74_v28, 0.0 }
  0xb3   :  { %v76_v29 = vld [vmem:[#allocation2 + $0x10] sm:$0xff] }
  0xb4   :  { %v80_v33 = vsel %vm33_vm0, %v76_v29, 0.0 }
  0xb5   :  { %v75_v30 = vld [vmem:[#allocation2 + $0x8] sm:$0xff] }
  0xb6   :  { %v78_v32 = vsel %vm33_vm0, %v75_v30, 0.0 }
  0xb7   :  { %v79_v34 = vadd.f32 %v78_v32, %v77_v31 }
  0xb9   :  { %v81_v35 = vadd.f32 %v80_v33, %v79_v34 }
  0xbb   :  { %82 = vadd.xlane.f32.xlu1 %v81_v35 }
 0x148   :  { %v83_v36 = vpop.xlane.xlu1 %82 }
 0x149   :  { %v84_v37 = vrot.slane %v83_v36, 4 }
 0x14b   :  { %v85_v38 = vadd.f32 %v84_v37, %v83_v36 }
 0x14d   :  { %v86_v39 = vrot.slane %v85_v38, 2 }
 0x14f   :  { %v87_v40 = vadd.f32 %v86_v39, %v85_v38 }
 0x151   :  { %v88_v41 = vrot.slane %v87_v40, 1 }
 0x153   :  { %v89_v42 = vadd.f32 %v88_v41, %v87_v40 }
 0x155   :  { %110 = vpush %v89_v42 }
 0x186   :  { %s111_s10 = spop %110 }
 0x187   :  { %v91_v43 = vstv %s111_s10 }
 0x188   :  { %v92_v44 = vmul.f32 0.05, %v91_v43 }
 0x18a   :  { %94 = vst.msk [vmem:[#allocation6] sm:$0x1] %vm93_vm1, %v92_v44 }
 0x18b   :  { %150 = shalt.err (!%p147_p12)
}
 0x18c   :  { %s151_s15 = scalar_lea.hbm %s244_s3, 16 }
 0x18d   :  { %p152_p13 = scmp.ne.s32.totalorder %s244_s3, %s151_s15  ;;  %p155_p0 = scmp.lt.u32.totalorder %s151_s15, %s244_s3 }
 0x18f   :  { %p157_p1 = pnand %p155_p0, %p152_p13 }
 0x191   :  { %160 = shalt.err (!%p157_p1)
}
 0x192   :  { %104 = dma.vmem_to_hbm [thread:$0]  %s102_s9, 16, %s244_s3, [#allocation5]  }
 0x193   :  { %163 = dma.done.wait [#allocation5], 16  }
 0x194   :  { %164 = vsyncadd [#allocation5], 4294967280 }
 0x195   :  { %108 = vsyncpa [#allocation4], 1 }
 0x196   :  { %109 = vsyncpa [#allocation5], 1 }

</bundles_post_ra>
